<compile_context>
chip_gen: v5e
topology: v5e:2x2
jax: 0.10.0
libtpu: 0.0.40
codegen_flags: <defaults>
</compile_context>

<pallas_src>
import functools

import jax
import jax.numpy as jnp
from jax import lax
from jax.experimental import pallas as pl
from jax.experimental.pallas import tpu as pltpu


def _round_up(x, m):
    return ((x + m - 1) // m) * m


def _pick_tile(total, candidates):
    for c in candidates:
        if total % c == 0:
            return c
    return total


# --------------------- Phase 1: scaled cosine similarities -------------------
def _sims_kernel(e1_ref, e2_ref, sims_ref, dot_acc, n1_acc, n2_acc, *, scale):
    k = pl.program_id(1)

    @pl.when(k == 0)
    def _():
        dot_acc[...] = jnp.zeros_like(dot_acc)
        n1_acc[...] = jnp.zeros_like(n1_acc)
        n2_acc[...] = jnp.zeros_like(n2_acc)

    # Upcast per tile after the DMA (keeps HBM traffic in the input dtype).
    e1 = e1_ref[...].astype(jnp.float32)          # [TB1, TD]
    e2 = e2_ref[...].astype(jnp.float32)          # [TB1, TD]
    dot_acc[...] += jnp.sum(e1 * e2, axis=1, keepdims=True)
    n1_acc[...] += jnp.sum(e1 * e1, axis=1, keepdims=True)
    n2_acc[...] += jnp.sum(e2 * e2, axis=1, keepdims=True)

    @pl.when(k == pl.num_programs(1) - 1)
    def _():
        # F.normalize eps = 1e-12 -> compare squared norms against eps^2;
        # rsqrt runs on the (otherwise idle) EUP slot.
        eps_sq = jnp.float32(1e-24)
        inv1 = lax.rsqrt(jnp.maximum(n1_acc[...], eps_sq))
        inv2 = lax.rsqrt(jnp.maximum(n2_acc[...], eps_sq))
        sims_ref[...] = dot_acc[...] * inv1 * inv2 * jnp.float32(scale)


# --------------- Phase 2: masked pairwise online logsumexp -------------------
def _pairwise_lse_kernel(s_col_ref, s_row_ref, d_col_ref, d_row_ref,
                         out_ref, m_acc, t_acc):
    i = pl.program_id(0)
    j = pl.program_id(1)

    @pl.when(jnp.logical_and(i == 0, j == 0))
    def _():
        # Running max starts at 0.0 == the implicit leading-zero logit, so the
        # online max is exactly max(0, max(masked sim_diff)).
        m_acc[...] = jnp.zeros_like(m_acc)
        t_acc[...] = jnp.zeros_like(t_acc)

    diff = s_col_ref[...] - s_row_ref[...]                      # [TB, TB]
    # Single vselect instead of (cast, sub, mul, sub). Keep mask math in f32.
    masked = jnp.where(d_col_ref[...] < d_row_ref[...], diff, jnp.float32(-1e12))

    tile_max = jnp.max(jnp.max(masked, axis=1, keepdims=True),
                       axis=0, keepdims=True)                   # (1, 1)
    m_old = m_acc[...]
    m_new = jnp.maximum(m_old, tile_max)
    tile_sum = jnp.sum(jnp.sum(jnp.exp(masked - m_new), axis=1, keepdims=True),
                       axis=0, keepdims=True)                   # (1, 1)
    t_acc[...] = t_acc[...] * jnp.exp(m_old - m_new) + tile_sum
    m_acc[...] = m_new

    @pl.when(jnp.logical_and(i == pl.num_programs(0) - 1,
                             j == pl.num_programs(1) - 1))
    def _():
        m = m_acc[...]
        total = t_acc[...] + jnp.exp(-m)     # add the concat([0]) term once
        out_ref[...] = m + jnp.log(total)


# --------------------------------- wrapper -----------------------------------
def cosent_loss(embeddings1, embeddings2, distances, scale=20.0):
    B, D = embeddings1.shape
    assert embeddings2.shape == (B, D)

    Bp = _round_up(B, 128)   # lane-dense pairwise tiles
    Dp = _round_up(D, 128)   # lane-dense embedding tiles

    # Zero-pad embeddings: padded rows get sims = 0 and are masked out below.
    e1 = jnp.zeros((Bp, Dp), embeddings1.dtype).at[:B, :D].set(embeddings1)
    e2 = jnp.zeros((Bp, Dp), embeddings2.dtype).at[:B, :D].set(embeddings2)

    d = distances.reshape(B).astype(jnp.float32)
    # Padded entries: +inf on the "i" side and -inf on the "j" side make every
    # pair that touches a padded index fail d_i < d_j, so it is masked out.
    d_col = jnp.full((Bp, 1), jnp.inf, jnp.float32).at[:B, 0].set(d)
    d_row = jnp.full((1, Bp), -jnp.inf, jnp.float32).at[0, :B].set(d)

    # ---- phase 1: per-pair scaled cosine similarities ----
    TB1 = _pick_tile(Bp, (256, 128))
    TD = _pick_tile(Dp, (2048, 1024, 512, 256, 128))
    sims_col = pl.pallas_call(
        functools.partial(_sims_kernel, scale=scale),
        out_shape=jax.ShapeDtypeStruct((Bp, 1), jnp.float32),
        grid_spec=pltpu.PrefetchScalarGridSpec(
            num_scalar_prefetch=0,
            grid=(Bp // TB1, Dp // TD),
            in_specs=[pl.BlockSpec((TB1, TD), lambda i, k: (i, k)),
                      pl.BlockSpec((TB1, TD), lambda i, k: (i, k))],
            out_specs=pl.BlockSpec((TB1, 1), lambda i, k: (i, 0)),
            scratch_shapes=[pltpu.VMEM((TB1, 1), jnp.float32)] * 3),
        compiler_params=pltpu.CompilerParams(
            dimension_semantics=("parallel", "arbitrary")),
    )(e1, e2)

    # Lane-dense [1, Bp] orientation, built once outside any kernel/loop.
    sims_row = sims_col.reshape(1, Bp)

    # ---- phase 2: masked pairwise logsumexp with online accumulator ----
    TB2 = _pick_tile(Bp, (256, 128))
    loss = pl.pallas_call(
        _pairwise_lse_kernel,
        out_shape=jax.ShapeDtypeStruct((1, 1), jnp.float32),
        grid_spec=pltpu.PrefetchScalarGridSpec(
            num_scalar_prefetch=0,
            grid=(Bp // TB2, Bp // TB2),
            in_specs=[pl.BlockSpec((TB2, 1), lambda i, j: (i, 0)),
                      pl.BlockSpec((1, TB2), lambda i, j: (0, j)),
                      pl.BlockSpec((TB2, 1), lambda i, j: (i, 0)),
                      pl.BlockSpec((1, TB2), lambda i, j: (0, j))],
            out_specs=pl.BlockSpec((1, 1), lambda i, j: (0, 0)),
            scratch_shapes=[pltpu.VMEM((1, 1), jnp.float32)] * 2),
        compiler_params=pltpu.CompilerParams(
            # Single shared (m, total) accumulator across the whole grid ->
            # both axes must stay sequential.
            dimension_semantics=("arbitrary", "arbitrary")),
    )(sims_col, sims_row, d_col, d_row)

    return loss[0, 0]


# ------------------------------ pure-JAX reference ----------------------------
def _reference(embeddings1, embeddings2, distances, scale=20.0):
    eps = 1e-12
    n1 = jnp.maximum(jnp.linalg.norm(embeddings1, axis=1, keepdims=True), eps)
    n2 = jnp.maximum(jnp.linalg.norm(embeddings2, axis=1, keepdims=True), eps)
    e1 = embeddings1 / n1
    e2 = embeddings2 / n2
    sims = jnp.sum(e1 * e2, axis=1) * scale
    sim_diff = sims[:, None] - sims[None, :]
    labels = (distances[:, None] < distances[None, :]).astype(jnp.float32)
    sim_diff = sim_diff - (1.0 - labels) * 1e12
    flat = jnp.concatenate([jnp.zeros((1,), jnp.float32), sim_diff.reshape(-1)])
    return jax.scipy.special.logsumexp(flat)


if __name__ == "__main__":
    key = jax.random.PRNGKey(0)
    k1, k2, k3, k4, k5, k6 = jax.random.split(key, 6)

    # Small config from the module spec: [batch, embedding_dim] + [batch].
    B, D = 8, 32
    e1 = jax.random.normal(k1, (B, D), dtype=jnp.float32)
    e2 = jax.random.normal(k2, (B, D), dtype=jnp.float32)
    dist = jax.random.uniform(k3, (B,), dtype=jnp.float32) * 100.0

    loss = cosent_loss(e1, e2, dist, scale=20.0)
    jax.block_until_ready(loss)
    ref = _reference(e1, e2, dist, scale=20.0)
    assert jnp.allclose(loss, ref, rtol=1e-4, atol=1e-4), (loss, ref)

    # Second config exercising the gridded paths: D reduction tiles,
    # multi-tile pairwise accumulator, and row/col padding masks.
    B2, D2 = 300, 64
    e1b = jax.random.normal(k4, (B2, D2), dtype=jnp.float32)
    e2b = jax.random.normal(k5, (B2, D2), dtype=jnp.float32)
    distb = jax.random.uniform(k6, (B2,), dtype=jnp.float32) * 100.0

    lossb = cosent_loss(e1b, e2b, distb, scale=20.0)
    jax.block_until_ready(lossb)
    refb = _reference(e1b, e2b, distb, scale=20.0)
    assert jnp.allclose(lossb, refb, rtol=1e-4, atol=1e-4), (lossb, refb)

    print("KERNEL_OK")
</pallas_src>

<mosaic_0001>
module attributes {stable_mosaic.version = 11 : i64} {
  func.func @_sims_kernel(%arg0: i32, %arg1: i32, %arg2: memref<128x128xf32, #tpu.memory_space<vmem>>, %arg3: memref<128x128xf32, #tpu.memory_space<vmem>>, %arg4: memref<128x1xf32, #tpu.memory_space<vmem>>, %arg5: memref<128x1xf32, #tpu.memory_space<vmem>>, %arg6: memref<128x1xf32, #tpu.memory_space<vmem>>, %arg7: memref<128x1xf32, #tpu.memory_space<vmem>>) attributes {dimension_semantics = [#tpu.dimension_semantics<parallel>, #tpu.dimension_semantics<arbitrary>], iteration_bounds = array<i64: 1, 1>, scalar_prefetch = 0 : i64, scratch_operands = 3 : i64, tpu.core_type = #tpu.core_type<tc>, window_params = [{transform_indices = @transform_0, window_bounds = array<i64: 128, 128>}, {transform_indices = @transform_1, window_bounds = array<i64: 128, 128>}, {transform_indices = @transform_2, window_bounds = array<i64: 128, 1>}]} {
    %c0_i32 = arith.constant 0 : i32
    %0 = arith.cmpi eq, %arg1, %c0_i32 : i32
    %1 = arith.extui %0 : i1 to i32
    %c0_i32_0 = arith.constant 0 : i32
    %2 = arith.cmpi ne, %1, %c0_i32_0 : i32
    scf.if %2 {
      %cst_20 = arith.constant 0.000000e+00 : f32
      %26 = vector.broadcast %cst_20 : f32 to vector<128x1xf32>
      %c0_21 = arith.constant 0 : index
      %c0_22 = arith.constant 0 : index
      %27 = vector.load %arg5[%c0_21, %c0_22] : memref<128x1xf32, #tpu.memory_space<vmem>>, vector<128x1xf32>
      tpu.vector_store %arg5[%c0_21, %c0_22], %26 {strides = array<i32>} : memref<128x1xf32, #tpu.memory_space<vmem>>, vector<128x1xf32>,
      %cst_23 = arith.constant 0.000000e+00 : f32
      %28 = vector.broadcast %cst_23 : f32 to vector<128x1xf32>
      %c0_24 = arith.constant 0 : index
      %c0_25 = arith.constant 0 : index
      %29 = vector.load %arg6[%c0_24, %c0_25] : memref<128x1xf32, #tpu.memory_space<vmem>>, vector<128x1xf32>
      tpu.vector_store %arg6[%c0_24, %c0_25], %28 {strides = array<i32>} : memref<128x1xf32, #tpu.memory_space<vmem>>, vector<128x1xf32>,
      %cst_26 = arith.constant 0.000000e+00 : f32
      %30 = vector.broadcast %cst_26 : f32 to vector<128x1xf32>
      %c0_27 = arith.constant 0 : index
      %c0_28 = arith.constant 0 : index
      %31 = vector.load %arg7[%c0_27, %c0_28] : memref<128x1xf32, #tpu.memory_space<vmem>>, vector<128x1xf32>
      tpu.vector_store %arg7[%c0_27, %c0_28], %30 {strides = array<i32>} : memref<128x1xf32, #tpu.memory_space<vmem>>, vector<128x1xf32>,
    } else {
    }
    %c0 = arith.constant 0 : index
    %c0_1 = arith.constant 0 : index
    %3 = vector.load %arg2[%c0, %c0_1] : memref<128x128xf32, #tpu.memory_space<vmem>>, vector<128x128xf32>
    %c0_2 = arith.constant 0 : index
    %c0_3 = arith.constant 0 : index
    %4 = vector.load %arg3[%c0_2, %c0_3] : memref<128x128xf32, #tpu.memory_space<vmem>>, vector<128x128xf32>
    %c0_4 = arith.constant 0 : index
    %c0_5 = arith.constant 0 : index
    %5 = vector.load %arg5[%c0_4, %c0_5] : memref<128x1xf32, #tpu.memory_space<vmem>>, vector<128x1xf32>
    %6 = arith.mulf %3, %4 : vector<128x128xf32>
    %cst = arith.constant dense<0.000000e+00> : vector<128xf32>
    %7 = vector.multi_reduction <add>, %6, %cst [1] : vector<128x128xf32> to vector<128xf32>
    %8 = vector.shape_cast %7 : vector<128xf32> to vector<128x1xf32>
    %9 = arith.addf %5, %8 : vector<128x1xf32>
    %c0_6 = arith.constant 0 : index
    %c0_7 = arith.constant 0 : index
    %10 = vector.load %arg5[%c0_6, %c0_7] : memref<128x1xf32, #tpu.memory_space<vmem>>, vector<128x1xf32>
    tpu.vector_store %arg5[%c0_6, %c0_7], %9 {strides = array<i32>} : memref<128x1xf32, #tpu.memory_space<vmem>>, vector<128x1xf32>,
    %c0_8 = arith.constant 0 : index
    %c0_9 = arith.constant 0 : index
    %11 = vector.load %arg6[%c0_8, %c0_9] : memref<128x1xf32, #tpu.memory_space<vmem>>, vector<128x1xf32>
    %12 = arith.mulf %3, %3 : vector<128x128xf32>
    %cst_10 = arith.constant dense<0.000000e+00> : vector<128xf32>
    %13 = vector.multi_reduction <add>, %12, %cst_10 [1] : vector<128x128xf32> to vector<128xf32>
    %14 = vector.shape_cast %13 : vector<128xf32> to vector<128x1xf32>
    %15 = arith.addf %11, %14 : vector<128x1xf32>
    %c0_11 = arith.constant 0 : index
    %c0_12 = arith.constant 0 : index
    %16 = vector.load %arg6[%c0_11, %c0_12] : memref<128x1xf32, #tpu.memory_space<vmem>>, vector<128x1xf32>
    tpu.vector_store %arg6[%c0_11, %c0_12], %15 {strides = array<i32>} : memref<128x1xf32, #tpu.memory_space<vmem>>, vector<128x1xf32>,
    %c0_13 = arith.constant 0 : index
    %c0_14 = arith.constant 0 : index
    %17 = vector.load %arg7[%c0_13, %c0_14] : memref<128x1xf32, #tpu.memory_space<vmem>>, vector<128x1xf32>
    %18 = arith.mulf %4, %4 : vector<128x128xf32>
    %cst_15 = arith.constant dense<0.000000e+00> : vector<128xf32>
    %19 = vector.multi_reduction <add>, %18, %cst_15 [1] : vector<128x128xf32> to vector<128xf32>
    %20 = vector.shape_cast %19 : vector<128xf32> to vector<128x1xf32>
    %21 = arith.addf %17, %20 : vector<128x1xf32>
    %c0_16 = arith.constant 0 : index
    %c0_17 = arith.constant 0 : index
    %22 = vector.load %arg7[%c0_16, %c0_17] : memref<128x1xf32, #tpu.memory_space<vmem>>, vector<128x1xf32>
    tpu.vector_store %arg7[%c0_16, %c0_17], %21 {strides = array<i32>} : memref<128x1xf32, #tpu.memory_space<vmem>>, vector<128x1xf32>,
    %c0_i32_18 = arith.constant 0 : i32
    %23 = arith.cmpi eq, %arg1, %c0_i32_18 : i32
    %24 = arith.extui %23 : i1 to i32
    %c0_i32_19 = arith.constant 0 : i32
    %25 = arith.cmpi ne, %24, %c0_i32_19 : i32
    scf.if %25 {
      %c0_20 = arith.constant 0 : index
      %c0_21 = arith.constant 0 : index
      %26 = vector.load %arg6[%c0_20, %c0_21] : memref<128x1xf32, #tpu.memory_space<vmem>>, vector<128x1xf32>
      %cst_22 = arith.constant 1.000000e-24 : f32
      %27 = vector.broadcast %cst_22 : f32 to vector<128x1xf32>
      %28 = arith.maximumf %26, %27 : vector<128x1xf32>
      %29 = math.rsqrt %28 : vector<128x1xf32>
      %c0_23 = arith.constant 0 : index
      %c0_24 = arith.constant 0 : index
      %30 = vector.load %arg7[%c0_23, %c0_24] : memref<128x1xf32, #tpu.memory_space<vmem>>, vector<128x1xf32>
      %cst_25 = arith.constant 1.000000e-24 : f32
      %31 = vector.broadcast %cst_25 : f32 to vector<128x1xf32>
      %32 = arith.maximumf %30, %31 : vector<128x1xf32>
      %33 = math.rsqrt %32 : vector<128x1xf32>
      %c0_26 = arith.constant 0 : index
      %c0_27 = arith.constant 0 : index
      %34 = vector.load %arg5[%c0_26, %c0_27] : memref<128x1xf32, #tpu.memory_space<vmem>>, vector<128x1xf32>
      %35 = arith.mulf %34, %29 : vector<128x1xf32>
      %36 = arith.mulf %35, %33 : vector<128x1xf32>
      %cst_28 = arith.constant 2.000000e+01 : f32
      %37 = vector.broadcast %cst_28 : f32 to vector<128x1xf32>
      %38 = arith.mulf %36, %37 : vector<128x1xf32>
      %c0_29 = arith.constant 0 : index
      %c0_30 = arith.constant 0 : index
      %39 = vector.load %arg4[%c0_29, %c0_30] : memref<128x1xf32, #tpu.memory_space<vmem>>, vector<128x1xf32>
      tpu.vector_store %arg4[%c0_29, %c0_30], %38 {strides = array<i32>} : memref<128x1xf32, #tpu.memory_space<vmem>>, vector<128x1xf32>,
    } else {
    }
    return
  }
  func.func @transform_0(%arg0: i32, %arg1: i32) -> (i32, i32) {
    %c0_i32 = arith.constant 0 : i32
    return %arg0, %arg1 : i32, i32
  }
  func.func @transform_1(%arg0: i32, %arg1: i32) -> (i32, i32) {
    %c0_i32 = arith.constant 0 : i32
    return %arg0, %arg1 : i32, i32
  }
  func.func @transform_2(%arg0: i32, %arg1: i32) -> (i32, i32) {
    %c0_i32 = arith.constant 0 : i32
    %c0_i32_0 = arith.constant 0 : i32
    return %arg0, %c0_i32 : i32, i32
  }
}

</mosaic_0001>

<bundles_post_ra>
// kernel: tpu_custom_call.1
= control target key start
LH: loop header
LB: loop body
LE: loop exit
PB: predicated region body
PF: predicated region fallthrough
CT: control target
= control target key end

     0   :  { %7 = vsyncpa [#allocation6], 0  ;;  %s1965_s0 = inlined_call_operand.hbm [shape: f32[128,128], index: 0, kind: input, shape index: {}]   ;;  %s1966_s1 = inlined_call_operand.hbm [shape: f32[128,128], index: 1, kind: input, shape index: {}]   ;;  %s1967_s2 = inlined_call_operand.vmem [shape: f32[128,1], index: 2, kind: output, shape index: {}]  }
   0x1   :  { %s13_s11 = sshll.u32 %s1965_s0, 4  ;;  %s14_s11 = int_to_ptr.hbm [resolvable:$true] %s13_s11 }
   0x2   :  { %8 = vsyncpa [#allocation8], 0  ;;  %s1011_s12 = smov [#allocation5]   ;;  %s26_s16 = sshll.u32 %s1966_s1, 4  ;;  %s27_s16 = int_to_ptr.hbm [resolvable:$true] %s26_s16 }
   0x3   :  { %s15_s13 = sshll.u32 %s1011_s12, 4  ;;  %s1012_s17 = smov 128   ;;  %s16_s13 = int_to_ptr.vmem [resolvable:$true] %s15_s13 }
   0x4   :  { %s1013_s18 = smov 8   ;;  %s1014_s19 = smov [#allocation7]  }
   0x5   :  { %21 = dma.hbm_to_vmem [thread:$0]  %s14_s11, 2048, %s16_s13, [#allocation6], %s1012_s17, %s1012_s17, %s1013_s18  }
   0x6   :  { %s28_s20 = sshll.u32 %s1014_s19, 4  ;;  %s29_s20 = int_to_ptr.vmem [resolvable:$true] %s28_s20 }
   0x7   :  { %34 = dma.hbm_to_vmem [thread:$0]  %s27_s16, 2048, %s29_s20, [#allocation8], %s1012_s17, %s1012_s17, %s1013_s18  }
   0x8   :  { %1007 = dma.done.wait [#allocation6], 2048  }
   0x9   :  { %1008 = vsyncadd [#allocation6], 4294965248 }
   0xa   :  { %1009 = dma.done.wait [#allocation8], 2048  }
   0xb   :  { %1010 = vsyncadd [#allocation8], 4294965248  ;;  %v1037_v0 = vld [vmem:[#allocation5 + $0x20] sm:$0xff]  ;;  %v1041_v2 = vld [vmem:[#allocation5 + $0x10] sm:$0xff]  ;;  %vm47_vm0 = vcmask 7168  }
   0xc   :  { %v1039_v1 = vld [vmem:[#allocation7 + $0x20] sm:$0xff]  ;;  %v1045_v4 = vld [vmem:[#allocation7 + $0x10] sm:$0xff]  ;;  %v1052_v9 = vld [vmem:[#allocation5 + $0x28] sm:$0xff]  ;;  %v245_v50 = vmul.f32 %v1037_v0, %v1037_v0  ;;  %v243_v52 = vmul.f32 %v1041_v2, %v1041_v2 }
   0xd   :  { %v148_v3 = vmul.f32 %v1039_v1, %v1037_v0  ;;  %v96_v5 = vld [vmem:[#allocation5] sm:$0xff]  ;;  %v146_v7 = vmul.f32 %v1045_v4, %v1041_v2  ;;  %v1054_v10 = vld [vmem:[#allocation7 + $0x28] sm:$0xff]  ;;  %v99_v11 = vld [vmem:[#allocation5 + $0x18] sm:$0xff]  ;;  %v246_v55 = vmul.f32 %v1052_v9, %v1052_v9  ;;  %v1015_v2 = vmov 0.0  }
   0xe   :  { %v1047_v6 = vld [vmem:[#allocation7] sm:$0xff]  ;;  %v1056_v12 = vld [vmem:[#allocation7 + $0x18] sm:$0xff]  ;;  %v97_v13 = vld [vmem:[#allocation5 + $0x8] sm:$0xff]  ;;  %v149_v15 = vmul.f32 %v1054_v10, %v1052_v9  ;;  %v241_v48 = vmul.f32 %v96_v5, %v96_v5  ;;  %v244_v51 = vmul.f32 %v99_v11, %v99_v11  ;;  %52 = vst.msk [vmem:[#allocation2 + $0x20] sm:$0xff] %vm47_vm0, %v1015_v2 }
   0xf   :  { %v144_v8 = vmul.f32 %v1047_v6, %v96_v5  ;;  %168 = vadd.xlane.f32.xlu2 %v148_v3  ;;  %164 = vadd.xlane.f32.xlu1 %v146_v7  ;;  %v1058_v14 = vld [vmem:[#allocation7 + $0x8] sm:$0xff]  ;;  %v147_v16 = vmul.f32 %v1056_v12, %v99_v11  ;;  %v104_v18 = vld [vmem:[#allocation5 + $0x40] sm:$0xff]  ;;  %v103_v20 = vld [vmem:[#allocation5 + $0x38] sm:$0xff]  ;;  %v242_v47 = vmul.f32 %v97_v13, %v97_v13 }
  0x10   :  { %v145_v17 = vmul.f32 %v1058_v14, %v97_v13  ;;  %v1064_v19 = vld [vmem:[#allocation7 + $0x40] sm:$0xff]  ;;  %v1066_v21 = vld [vmem:[#allocation7 + $0x38] sm:$0xff]  ;;  %v102_v22 = vld [vmem:[#allocation5 + $0x30] sm:$0xff]  ;;  %v248_v53 = vmul.f32 %v103_v20, %v103_v20  ;;  %v249_v58 = vmul.f32 %v104_v18, %v104_v18  ;;  %v337_v62 = vmul.f32 %v1047_v6, %v1047_v6  ;;  %48 = vst.msk [vmem:[#allocation2] sm:$0xff] %vm47_vm0, %v1015_v2 }
  0x11   :  { %160 = vadd.xlane.f32.xlu0 %v144_v8  ;;  %v1068_v23 = vld [vmem:[#allocation7 + $0x30] sm:$0xff]  ;;  %v152_v24 = vmul.f32 %v1064_v19, %v104_v18  ;;  %v151_v25 = vmul.f32 %v1066_v21, %v103_v20  ;;  %v107_v27 = vld [vmem:[#allocation5 + $0x58] sm:$0xff]  ;;  %v105_v31 = vld [vmem:[#allocation5 + $0x48] sm:$0xff]  ;;  %v247_v54 = vmul.f32 %v102_v22, %v102_v22  ;;  %49 = vst.msk [vmem:[#allocation2 + $0x8] sm:$0xff] %vm47_vm0, %v1015_v2 }
  0x12   :  { %v150_v26 = vmul.f32 %v1068_v23, %v102_v22  ;;  %v1073_v28 = vld [vmem:[#allocation7 + $0x58] sm:$0xff]  ;;  %v106_v29 = vld [vmem:[#allocation5 + $0x50] sm:$0xff]  ;;  %v1077_v32 = vld [vmem:[#allocation7 + $0x48] sm:$0xff]  ;;  %v250_v57 = vmul.f32 %v105_v31, %v105_v31  ;;  %v252_v61 = vmul.f32 %v107_v27, %v107_v27  ;;  %50 = vst.msk [vmem:[#allocation2 + $0x10] sm:$0xff] %vm47_vm0, %v1015_v2  ;;  %v340_v3 = vmul.f32 %v1056_v12, %v1056_v12 }
  0x13   :  { %v1075_v30 = vld [vmem:[#allocation7 + $0x50] sm:$0xff]  ;;  %v155_v33 = vmul.f32 %v1073_v28, %v107_v27  ;;  %v153_v35 = vmul.f32 %v1077_v32, %v105_v31  ;;  %v109_v38 = vld [vmem:[#allocation5 + $0x68] sm:$0xff]  ;;  %v108_v40 = vld [vmem:[#allocation5 + $0x60] sm:$0xff]  ;;  %v251_v56 = vmul.f32 %v106_v29, %v106_v29  ;;  %51 = vst.msk [vmem:[#allocation2 + $0x18] sm:$0xff] %vm47_vm0, %v1015_v2  ;;  %v339_v5 = vmul.f32 %v1045_v4, %v1045_v4 }
  0x14   :  { %v154_v34 = vmul.f32 %v1075_v30, %v106_v29  ;;  %v110_v36 = vld [vmem:[#allocation5 + $0x70] sm:$0xff]  ;;  %v1084_v39 = vld [vmem:[#allocation7 + $0x68] sm:$0xff]  ;;  %v1086_v41 = vld [vmem:[#allocation7 + $0x60] sm:$0xff]  ;;  %v254_v59 = vmul.f32 %v109_v38, %v109_v38  ;;  %v253_v60 = vmul.f32 %v108_v40, %v108_v40  ;;  %53 = vst.msk [vmem:[#allocation2 + $0x28] sm:$0xff] %vm47_vm0, %v1015_v2  ;;  %v338_v6 = vmul.f32 %v1058_v14, %v1058_v14 }
  0x15   :  { %v1082_v37 = vld [vmem:[#allocation7 + $0x70] sm:$0xff]  ;;  %v157_v43 = vmul.f32 %v1084_v39, %v109_v38  ;;  %v156_v44 = vmul.f32 %v1086_v41, %v108_v40  ;;  %v111_v45 = vld [vmem:[#allocation5 + $0x78] sm:$0xff]  ;;  %v255_v0 = vmul.f32 %v110_v36, %v110_v36  ;;  %54 = vst.msk [vmem:[#allocation2 + $0x30] sm:$0xff] %vm47_vm0, %v1015_v2  ;;  %v343_v4 = vmul.f32 %v1068_v23, %v1068_v23  ;;  %v132_v14 = vld [vmem:[#allocation2 + $0x20] sm:$0xff] }
  0x16   :  { %v158_v42 = vmul.f32 %v1082_v37, %v110_v36  ;;  %v1091_v46 = vld [vmem:[#allocation7 + $0x78] sm:$0xff]  ;;  %v256_v63 = vmul.f32 %v111_v45, %v111_v45  ;;  %55 = vst.msk [vmem:[#allocation2 + $0x38] sm:$0xff] %vm47_vm0, %v1015_v2  ;;  %v342_v7 = vmul.f32 %v1054_v10, %v1054_v10  ;;  %v341_v8 = vmul.f32 %v1039_v1, %v1039_v1 }
  0x17   :  { %170 = vadd.xlane.f32.xlu2 %v149_v15  ;;  %166 = vadd.xlane.f32.xlu1 %v147_v16  ;;  %v159_v49 = vmul.f32 %v1091_v46, %v111_v45  ;;  %56 = vst.msk [vmem:[#allocation2 + $0x40] sm:$0xff] %vm47_vm0, %v1015_v2  ;;  %v346_v1 = vmul.f32 %v1077_v32, %v1077_v32  ;;  %v128_v23 = vld [vmem:[#allocation2] sm:$0xff] }
  0x18   :  { %57 = vst.msk [vmem:[#allocation2 + $0x48] sm:$0xff] %vm47_vm0, %v1015_v2  ;;  %v345_v9 = vmul.f32 %v1064_v19, %v1064_v19  ;;  %v344_v10 = vmul.f32 %v1066_v21, %v1066_v21  ;;  %v349_v11 = vmul.f32 %v1086_v41, %v1086_v41  ;;  %v348_v12 = vmul.f32 %v1073_v28, %v1073_v28  ;;  %v129_v29 = vld [vmem:[#allocation2 + $0x8] sm:$0xff] }
  0x19   :  { %162 = vadd.xlane.f32.xlu0 %v145_v17  ;;  %58 = vst.msk [vmem:[#allocation2 + $0x50] sm:$0xff] %vm47_vm0, %v1015_v2  ;;  %v347_v13 = vmul.f32 %v1075_v30, %v1075_v30  ;;  %v352_v19 = vmul.f32 %v1091_v46, %v1091_v46  ;;  %v351_v20 = vmul.f32 %v1082_v37, %v1082_v37  ;;  %v130_v22 = vld [vmem:[#allocation2 + $0x10] sm:$0xff] }
  0x1a   :  { %59 = vst.msk [vmem:[#allocation2 + $0x58] sm:$0xff] %vm47_vm0, %v1015_v2  ;;  %v350_v21 = vmul.f32 %v1084_v39, %v1084_v39 }
  0x1b   :  { %60 = vst.msk [vmem:[#allocation2 + $0x60] sm:$0xff] %vm47_vm0, %v1015_v2 }
  0x1c   :  { %61 = vst.msk [vmem:[#allocation2 + $0x68] sm:$0xff] %vm47_vm0, %v1015_v2  ;;  %v134_v37 = vld [vmem:[#allocation2 + $0x30] sm:$0xff] }
  0x1d   :  { %62 = vst.msk [vmem:[#allocation2 + $0x70] sm:$0xff] %vm47_vm0, %v1015_v2  ;;  %v135_v36 = vld [vmem:[#allocation2 + $0x38] sm:$0xff] }
  0x1e   :  { %63 = vst.msk [vmem:[#allocation2 + $0x78] sm:$0xff] %vm47_vm0, %v1015_v2 }
  0x1f   :  { %176 = vadd.xlane.f32.xlu2 %v152_v24  ;;  %174 = vadd.xlane.f32.xlu1 %v151_v25  ;;  %64 = vst.msk [vmem:[#allocation3] sm:$0xff] %vm47_vm0, %v1015_v2  ;;  %v133_v24 = vld [vmem:[#allocation2 + $0x28] sm:$0xff] }
  0x20   :  { %65 = vst.msk [vmem:[#allocation3 + $0x8] sm:$0xff] %vm47_vm0, %v1015_v2  ;;  %v138_v45 = vld [vmem:[#allocation2 + $0x50] sm:$0xff]  ;;  %v137_v46 = vld [vmem:[#allocation2 + $0x48] sm:$0xff] }
  0x21   :  { %172 = vadd.xlane.f32.xlu0 %v150_v26  ;;  %66 = vst.msk [vmem:[#allocation3 + $0x10] sm:$0xff] %vm47_vm0, %v1015_v2  ;;  %v131_v26 = vld [vmem:[#allocation2 + $0x18] sm:$0xff] }
  0x22   :  { %67 = vst.msk [vmem:[#allocation3 + $0x18] sm:$0xff] %vm47_vm0, %v1015_v2 }
  0x23   :  { %68 = vst.msk [vmem:[#allocation3 + $0x20] sm:$0xff] %vm47_vm0, %v1015_v2 }
  0x24   :  { %69 = vst.msk [vmem:[#allocation3 + $0x28] sm:$0xff] %vm47_vm0, %v1015_v2 }
  0x25   :  { %70 = vst.msk [vmem:[#allocation3 + $0x30] sm:$0xff] %vm47_vm0, %v1015_v2 }
  0x26   :  { %71 = vst.msk [vmem:[#allocation3 + $0x38] sm:$0xff] %vm47_vm0, %v1015_v2 }
  0x27   :  { %182 = vadd.xlane.f32.xlu2 %v155_v33  ;;  %180 = vadd.xlane.f32.xlu1 %v154_v34  ;;  %72 = vst.msk [vmem:[#allocation3 + $0x40] sm:$0xff] %vm47_vm0, %v1015_v2 }
  0x28   :  { %73 = vst.msk [vmem:[#allocation3 + $0x48] sm:$0xff] %vm47_vm0, %v1015_v2 }
  0x29   :  { %178 = vadd.xlane.f32.xlu0 %v153_v35  ;;  %74 = vst.msk [vmem:[#allocation3 + $0x50] sm:$0xff] %vm47_vm0, %v1015_v2  ;;  %v136_v35 = vld [vmem:[#allocation2 + $0x40] sm:$0xff] }
  0x2a   :  { %75 = vst.msk [vmem:[#allocation3 + $0x58] sm:$0xff] %vm47_vm0, %v1015_v2 }
  0x2b   :  { %76 = vst.msk [vmem:[#allocation3 + $0x60] sm:$0xff] %vm47_vm0, %v1015_v2 }
  0x2c   :  { %77 = vst.msk [vmem:[#allocation3 + $0x68] sm:$0xff] %vm47_vm0, %v1015_v2 }
  0x2d   :  { %78 = vst.msk [vmem:[#allocation3 + $0x70] sm:$0xff] %vm47_vm0, %v1015_v2 }
  0x2e   :  { %79 = vst.msk [vmem:[#allocation3 + $0x78] sm:$0xff] %vm47_vm0, %v1015_v2 }
  0x2f   :  { %188 = vadd.xlane.f32.xlu2 %v158_v42  ;;  %186 = vadd.xlane.f32.xlu1 %v157_v43  ;;  %80 = vst.msk [vmem:[#allocation4] sm:$0xff] %vm47_vm0, %v1015_v2 }
  0x30   :  { %81 = vst.msk [vmem:[#allocation4 + $0x8] sm:$0xff] %vm47_vm0, %v1015_v2 }
  0x31   :  { %184 = vadd.xlane.f32.xlu0 %v156_v44  ;;  %82 = vst.msk [vmem:[#allocation4 + $0x10] sm:$0xff] %vm47_vm0, %v1015_v2  ;;  %v139_v44 = vld [vmem:[#allocation2 + $0x58] sm:$0xff] }
  0x32   :  { %83 = vst.msk [vmem:[#allocation4 + $0x18] sm:$0xff] %vm47_vm0, %v1015_v2 }
  0x33   :  { %84 = vst.msk [vmem:[#allocation4 + $0x20] sm:$0xff] %vm47_vm0, %v1015_v2 }
  0x34   :  { %85 = vst.msk [vmem:[#allocation4 + $0x28] sm:$0xff] %vm47_vm0, %v1015_v2 }
  0x35   :  { %86 = vst.msk [vmem:[#allocation4 + $0x30] sm:$0xff] %vm47_vm0, %v1015_v2 }
  0x36   :  { %87 = vst.msk [vmem:[#allocation4 + $0x38] sm:$0xff] %vm47_vm0, %v1015_v2 }
  0x37   :  { %259 = vadd.xlane.f32.xlu2 %v242_v47  ;;  %257 = vadd.xlane.f32.xlu1 %v241_v48  ;;  %88 = vst.msk [vmem:[#allocation4 + $0x40] sm:$0xff] %vm47_vm0, %v1015_v2 }
  0x38   :  { %89 = vst.msk [vmem:[#allocation4 + $0x48] sm:$0xff] %vm47_vm0, %v1015_v2 }
  0x39   :  { %190 = vadd.xlane.f32.xlu0 %v159_v49  ;;  %90 = vst.msk [vmem:[#allocation4 + $0x50] sm:$0xff] %vm47_vm0, %v1015_v2 }
  0x3a   :  { %91 = vst.msk [vmem:[#allocation4 + $0x58] sm:$0xff] %vm47_vm0, %v1015_v2 }
  0x3b   :  { %92 = vst.msk [vmem:[#allocation4 + $0x60] sm:$0xff] %vm47_vm0, %v1015_v2 }
  0x3c   :  { %93 = vst.msk [vmem:[#allocation4 + $0x68] sm:$0xff] %vm47_vm0, %v1015_v2 }
  0x3d   :  { %94 = vst.msk [vmem:[#allocation4 + $0x70] sm:$0xff] %vm47_vm0, %v1015_v2 }
  0x3e   :  { %95 = vst.msk [vmem:[#allocation4 + $0x78] sm:$0xff] %vm47_vm0, %v1015_v2 }
  0x3f   :  { %265 = vadd.xlane.f32.xlu2 %v245_v50  ;;  %263 = vadd.xlane.f32.xlu1 %v244_v51 }
  0x41   :  { %261 = vadd.xlane.f32.xlu0 %v243_v52 }
  0x47   :  { %271 = vadd.xlane.f32.xlu2 %v248_v53  ;;  %269 = vadd.xlane.f32.xlu1 %v247_v54  ;;  %v142_v53 = vld [vmem:[#allocation2 + $0x70] sm:$0xff]  ;;  %v141_v54 = vld [vmem:[#allocation2 + $0x68] sm:$0xff] }
  0x49   :  { %267 = vadd.xlane.f32.xlu0 %v246_v55  ;;  %v140_v55 = vld [vmem:[#allocation2 + $0x60] sm:$0xff] }
  0x4f   :  { %277 = vadd.xlane.f32.xlu2 %v251_v56  ;;  %275 = vadd.xlane.f32.xlu1 %v250_v57 }
  0x51   :  { %273 = vadd.xlane.f32.xlu0 %v249_v58 }
  0x57   :  { %283 = vadd.xlane.f32.xlu2 %v254_v59  ;;  %281 = vadd.xlane.f32.xlu1 %v253_v60 }
  0x59   :  { %279 = vadd.xlane.f32.xlu0 %v252_v61 }
  0x5f   :  { %353 = vadd.xlane.f32.xlu2 %v337_v62  ;;  %287 = vadd.xlane.f32.xlu1 %v256_v63  ;;  %v226_v62 = vld [vmem:[#allocation3 + $0x8] sm:$0xff]  ;;  %v225_v63 = vld [vmem:[#allocation3] sm:$0xff] }
  0x61   :  { %285 = vadd.xlane.f32.xlu0 %v255_v0  ;;  %v143_v0 = vld [vmem:[#allocation2 + $0x78] sm:$0xff] }
  0x67   :  { %359 = vadd.xlane.f32.xlu2 %v340_v3  ;;  %357 = vadd.xlane.f32.xlu1 %v339_v5 }
  0x69   :  { %355 = vadd.xlane.f32.xlu0 %v338_v6 }
  0x6f   :  { %365 = vadd.xlane.f32.xlu2 %v343_v4  ;;  %363 = vadd.xlane.f32.xlu1 %v342_v7 }
  0x71   :  { %361 = vadd.xlane.f32.xlu0 %v341_v8  ;;  %v229_v8 = vld [vmem:[#allocation3 + $0x20] sm:$0xff] }
  0x77   :  { %371 = vadd.xlane.f32.xlu2 %v346_v1  ;;  %369 = vadd.xlane.f32.xlu1 %v345_v9  ;;  %v228_v1 = vld [vmem:[#allocation3 + $0x18] sm:$0xff]  ;;  %v227_v9 = vld [vmem:[#allocation3 + $0x10] sm:$0xff] }
  0x79   :  { %367 = vadd.xlane.f32.xlu0 %v344_v10 }
  0x7f   :  { %377 = vadd.xlane.f32.xlu2 %v349_v11  ;;  %375 = vadd.xlane.f32.xlu1 %v348_v12 }
  0x81   :  { %373 = vadd.xlane.f32.xlu0 %v347_v13 }
  0x82   :  { %v169_v15 = vpop.xlane.xlu2 %168  ;;  %v165_v17 = vpop.xlane.xlu1 %164 }
  0x83   :  { %v196_v16 = vadd.f32 %v169_v15, %v132_v14  ;;  %v194_v25 = vadd.f32 %v165_v17, %v130_v22  ;;  %v230_v22 = vld [vmem:[#allocation3 + $0x28] sm:$0xff] }
  0x84   :  { %v161_v18 = vpop.xlane.xlu0 %160 }
  0x85   :  { %213 = vst.msk [vmem:[#allocation2 + $0x20] sm:$0xff] %vm47_vm0, %v196_v16  ;;  %v192_v27 = vadd.f32 %v161_v18, %v128_v23 }
  0x86   :  { %211 = vst.msk [vmem:[#allocation2 + $0x10] sm:$0xff] %vm47_vm0, %v194_v25 }
  0x87   :  { %383 = vadd.xlane.f32.xlu2 %v352_v19  ;;  %381 = vadd.xlane.f32.xlu1 %v351_v20  ;;  %209 = vst.msk [vmem:[#allocation2] sm:$0xff] %vm47_vm0, %v192_v27  ;;  %v232_v20 = vld [vmem:[#allocation3 + $0x38] sm:$0xff] }
  0x89   :  { %379 = vadd.xlane.f32.xlu0 %v350_v21  ;;  %v231_v21 = vld [vmem:[#allocation3 + $0x30] sm:$0xff] }
  0x8a   :  { %v171_v28 = vpop.xlane.xlu2 %170  ;;  %v167_v31 = vpop.xlane.xlu1 %166 }
  0x8b   :  { %v197_v30 = vadd.f32 %v171_v28, %v133_v24  ;;  %v195_v33 = vadd.f32 %v167_v31, %v131_v26 }
  0x8c   :  { %v163_v32 = vpop.xlane.xlu0 %162 }
  0x8d   :  { %v193_v34 = vadd.f32 %v163_v32, %v129_v29  ;;  %214 = vst.msk [vmem:[#allocation2 + $0x28] sm:$0xff] %vm47_vm0, %v197_v30 }
  0x8e   :  { %212 = vst.msk [vmem:[#allocation2 + $0x18] sm:$0xff] %vm47_vm0, %v195_v33 }
  0x8f   :  { %210 = vst.msk [vmem:[#allocation2 + $0x8] sm:$0xff] %vm47_vm0, %v193_v34 }
  0x92   :  { %v177_v38 = vpop.xlane.xlu2 %176  ;;  %v175_v40 = vpop.xlane.xlu1 %174 }
  0x93   :  { %v200_v39 = vadd.f32 %v177_v38, %v136_v35  ;;  %v199_v42 = vadd.f32 %v175_v40, %v135_v36  ;;  %v234_v38 = vld [vmem:[#allocation3 + $0x48] sm:$0xff] }
  0x94   :  { %v173_v41 = vpop.xlane.xlu0 %172 }
  0x95   :  { %v198_v43 = vadd.f32 %v173_v41, %v134_v37  ;;  %217 = vst.msk [vmem:[#allocation2 + $0x40] sm:$0xff] %vm47_vm0, %v200_v39  ;;  %v235_v37 = vld [vmem:[#allocation3 + $0x50] sm:$0xff]  ;;  %v233_v39 = vld [vmem:[#allocation3 + $0x40] sm:$0xff] }
  0x96   :  { %216 = vst.msk [vmem:[#allocation2 + $0x38] sm:$0xff] %vm47_vm0, %v199_v42 }
  0x97   :  { %215 = vst.msk [vmem:[#allocation2 + $0x30] sm:$0xff] %vm47_vm0, %v198_v43 }
  0x9a   :  { %v183_v47 = vpop.xlane.xlu2 %182  ;;  %v181_v49 = vpop.xlane.xlu1 %180 }
  0x9b   :  { %v203_v48 = vadd.f32 %v183_v47, %v139_v44  ;;  %v202_v51 = vadd.f32 %v181_v49, %v138_v45 }
  0x9c   :  { %v179_v50 = vpop.xlane.xlu0 %178 }
  0x9d   :  { %v201_v52 = vadd.f32 %v179_v50, %v137_v46  ;;  %220 = vst.msk [vmem:[#allocation2 + $0x58] sm:$0xff] %vm47_vm0, %v203_v48 }
  0x9e   :  { %219 = vst.msk [vmem:[#allocation2 + $0x50] sm:$0xff] %vm47_vm0, %v202_v51 }
  0x9f   :  { %218 = vst.msk [vmem:[#allocation2 + $0x48] sm:$0xff] %vm47_vm0, %v201_v52 }
  0xa2   :  { %v189_v56 = vpop.xlane.xlu2 %188  ;;  %v187_v58 = vpop.xlane.xlu1 %186 }
  0xa3   :  { %v206_v57 = vadd.f32 %v189_v56, %v142_v53  ;;  %v205_v60 = vadd.f32 %v187_v58, %v141_v54  ;;  %v238_v56 = vld [vmem:[#allocation3 + $0x68] sm:$0xff]  ;;  %v237_v58 = vld [vmem:[#allocation3 + $0x60] sm:$0xff] }
  0xa4   :  { %v185_v59 = vpop.xlane.xlu0 %184 }
  0xa5   :  { %v204_v61 = vadd.f32 %v185_v59, %v140_v55  ;;  %223 = vst.msk [vmem:[#allocation2 + $0x70] sm:$0xff] %vm47_vm0, %v206_v57  ;;  %v236_v59 = vld [vmem:[#allocation3 + $0x58] sm:$0xff] }
  0xa6   :  { %222 = vst.msk [vmem:[#allocation2 + $0x68] sm:$0xff] %vm47_vm0, %v205_v60 }
  0xa7   :  { %221 = vst.msk [vmem:[#allocation2 + $0x60] sm:$0xff] %vm47_vm0, %v204_v61 }
  0xaa   :  { %v260_v2 = vpop.xlane.xlu2 %259  ;;  %v258_v5 = vpop.xlane.xlu1 %257 }
  0xab   :  { %v290_v3 = vadd.f32 %v260_v2, %v226_v62  ;;  %v289_v4 = vadd.f32 %v258_v5, %v225_v63 }
  0xac   :  { %v191_v6 = vpop.xlane.xlu0 %190 }
  0xad   :  { %v207_v7 = vadd.f32 %v191_v6, %v143_v0  ;;  %306 = vst.msk [vmem:[#allocation3 + $0x8] sm:$0xff] %vm47_vm0, %v290_v3 }
  0xae   :  { %305 = vst.msk [vmem:[#allocation3] sm:$0xff] %vm47_vm0, %v289_v4 }
  0xaf   :  { %224 = vst.msk [vmem:[#allocation2 + $0x78] sm:$0xff] %vm47_vm0, %v207_v7 }
  0xb2   :  { %v266_v10 = vpop.xlane.xlu2 %265  ;;  %v264_v12 = vpop.xlane.xlu1 %263 }
  0xb3   :  { %v293_v11 = vadd.f32 %v266_v10, %v229_v8  ;;  %v292_v15 = vadd.f32 %v264_v12, %v228_v1 }
  0xb4   :  { %v262_v13 = vpop.xlane.xlu0 %261  ;;  %v421_v14 = vld [vmem:[#allocation3 + $0x8] sm:$0xff] }
  0xb5   :  { %v291_v16 = vadd.f32 %v262_v13, %v227_v9  ;;  %v1246_v17 = vmax.f32 %v421_v14, 1e-24  ;;  %v420_v18 = vld [vmem:[#allocation3] sm:$0xff]  ;;  %309 = vst.msk [vmem:[#allocation3 + $0x20] sm:$0xff] %vm47_vm0, %v293_v11 }
  0xb6   :  { %v1249_v19 = vmax.f32 %v420_v18, 1e-24  ;;  %308 = vst.msk [vmem:[#allocation3 + $0x18] sm:$0xff] %vm47_vm0, %v292_v15 }
  0xb7   :  { %307 = vst.msk [vmem:[#allocation3 + $0x10] sm:$0xff] %vm47_vm0, %v291_v16  ;;  %895 = vrsqrt.f32 %v1246_v17  ;;  %vm468_vm3 = vweird.f32 %v1246_v17 }
  0xb8   :  { %897 = vrsqrt.f32 %v1249_v19  ;;  %vm458_vm5 = vweird.f32 %v1249_v19 }
  0xba   :  { %v272_v23 = vpop.xlane.xlu2 %271  ;;  %v270_v25 = vpop.xlane.xlu1 %269 }
  0xbb   :  { %v296_v24 = vadd.f32 %v272_v23, %v232_v20  ;;  %v295_v28 = vadd.f32 %v270_v25, %v231_v21 }
  0xbc   :  { %v268_v26 = vpop.xlane.xlu0 %267  ;;  %v424_v27 = vld [vmem:[#allocation3 + $0x20] sm:$0xff] }
  0xbd   :  { %v294_v29 = vadd.f32 %v268_v26, %v230_v22  ;;  %v1255_v30 = vmax.f32 %v424_v27, 1e-24  ;;  %v423_v31 = vld [vmem:[#allocation3 + $0x18] sm:$0xff]  ;;  %312 = vst.msk [vmem:[#allocation3 + $0x38] sm:$0xff] %vm47_vm0, %v296_v24  ;;  %v1259_v33 = vpop.eup %895  ;;  %v321_v22 = vld [vmem:[#allocation4] sm:$0xff] }
  0xbe   :  { %v422_v32 = vld [vmem:[#allocation3 + $0x10] sm:$0xff]  ;;  %311 = vst.msk [vmem:[#allocation3 + $0x30] sm:$0xff] %vm47_vm0, %v295_v28  ;;  %v1261_v34 = vmax.f32 %v423_v31, 1e-24  ;;  %v1264_v35 = vpop.eup %897  ;;  %v463_v40 = vmul.f32 %v1259_v33, %v1246_v17  ;;  %vm469_vm1 = vweird.f32 %v1259_v33 }
  0xbf   :  { %310 = vst.msk [vmem:[#allocation3 + $0x28] sm:$0xff] %vm47_vm0, %v294_v29  ;;  %v1266_v36 = vmax.f32 %v422_v32, 1e-24  ;;  %899 = vrsqrt.f32 %v1255_v30  ;;  %v453_v42 = vmul.f32 %v1264_v35, %v1249_v19  ;;  %vm459_vm2 = vweird.f32 %v1264_v35  ;;  %vm1334_vm4 = vmor %vm468_vm3, %vm469_vm1 }
  0xc0   :  { %901 = vrsqrt.f32 %v1261_v34  ;;  %v464_v51 = vmul.f32 %v1259_v33, %v463_v40  ;;  %vm1347_vm6 = vmor %vm458_vm5, %vm459_vm2  ;;  %vm498_vm7 = vweird.f32 %v1255_v30  ;;  %vm488_vm8 = vweird.f32 %v1261_v34 }
  0xc1   :  { %903 = vrsqrt.f32 %v1266_v36  ;;  %v454_v54 = vmul.f32 %v1264_v35, %v453_v42  ;;  %vm478_vm11 = vweird.f32 %v1266_v36 }
  0xc2   :  { %v278_v41 = vpop.xlane.xlu2 %277  ;;  %v276_v44 = vpop.xlane.xlu1 %275  ;;  %v465_v61 = vmul.f32 0.5, %v464_v51 }
  0xc3   :  { %v299_v43 = vadd.f32 %v278_v41, %v235_v37  ;;  %v298_v47 = vadd.f32 %v276_v44, %v234_v38  ;;  %v455_v0 = vmul.f32 0.5, %v454_v54 }
  0xc4   :  { %v274_v45 = vpop.xlane.xlu0 %273  ;;  %v427_v46 = vld [vmem:[#allocation3 + $0x38] sm:$0xff]  ;;  %v466_v12 = vsub.f32 1.5, %v465_v61  ;;  %v239_v61 = vld [vmem:[#allocation3 + $0x70] sm:$0xff] }
  0xc5   :  { %v297_v48 = vadd.f32 %v274_v45, %v233_v39  ;;  %v1275_v49 = vmax.f32 %v427_v46, 1e-24  ;;  %v426_v50 = vld [vmem:[#allocation3 + $0x30] sm:$0xff]  ;;  %315 = vst.msk [vmem:[#allocation3 + $0x50] sm:$0xff] %vm47_vm0, %v299_v43  ;;  %v1282_v53 = vpop.eup %899  ;;  %v456_v15 = vsub.f32 1.5, %v455_v0 }
  0xc6   :  { %v1279_v52 = vmax.f32 %v426_v50, 1e-24  ;;  %314 = vst.msk [vmem:[#allocation3 + $0x48] sm:$0xff] %vm47_vm0, %v298_v47  ;;  %v425_v55 = vld [vmem:[#allocation3 + $0x28] sm:$0xff]  ;;  %v1288_v57 = vpop.eup %901  ;;  %v493_v62 = vmul.f32 %v1282_v53, %v1255_v30  ;;  %v467_v25 = vmul.f32 %v1259_v33, %v466_v12  ;;  %vm499_vm9 = vweird.f32 %v1282_v53 }
  0xc7   :  { %905 = vrsqrt.f32 %v1275_v49  ;;  %313 = vst.msk [vmem:[#allocation3 + $0x40] sm:$0xff] %vm47_vm0, %v297_v48  ;;  %v1290_v60 = vpop.eup %903  ;;  %v1294_v2 = vmax.f32 %v425_v55, 1e-24  ;;  %v483_v4 = vmul.f32 %v1288_v57, %v1261_v34  ;;  %v457_v32 = vmul.f32 %v1264_v35, %v456_v15  ;;  %v805_v50 = vld [vmem:[#allocation2 + $0x8] sm:$0xff]  ;;  %vm1395_vm14 = vmor %vm498_vm7, %vm499_vm9 }
  0xc8   :  { %907 = vrsqrt.f32 %v1279_v52  ;;  %v473_v10 = vmul.f32 %v1290_v60, %v1266_v36  ;;  %v494_v13 = vmul.f32 %v1282_v53, %v493_v62  ;;  %v471_v46 = vsel %vm1334_vm4, %v1259_v33, %v467_v25  ;;  %v324_v62 = vld [vmem:[#allocation4 + $0x18] sm:$0xff] }
  0xc9   :  { %909 = vrsqrt.f32 %v1294_v2  ;;  %v484_v20 = vmul.f32 %v1288_v57, %v483_v4  ;;  %v461_v51 = vsel %vm1347_vm6, %v1264_v35, %v457_v32  ;;  %vm489_vm10 = vweird.f32 %v1288_v57 }
  0xca   :  { %v284_v63 = vpop.xlane.xlu2 %283  ;;  %v282_v5 = vpop.xlane.xlu1 %281  ;;  %v474_v23 = vmul.f32 %v1290_v60, %v473_v10  ;;  %v495_v26 = vmul.f32 0.5, %v494_v13  ;;  %v1365_v35 = vmul.f32 %v805_v50, %v471_v46  ;;  %vm528_vm12 = vweird.f32 %v1275_v49  ;;  %vm1411_vm15 = vmor %vm488_vm8, %vm489_vm10  ;;  %v322_v50 = vld [vmem:[#allocation4 + $0x8] sm:$0xff] }
  0xcb   :  { %v302_v3 = vadd.f32 %v284_v63, %v238_v56  ;;  %v301_v8 = vadd.f32 %v282_v5, %v237_v58  ;;  %v485_v40 = vmul.f32 0.5, %v484_v20  ;;  %v804_v63 = vld [vmem:[#allocation2] sm:$0xff]  ;;  %v323_v20 = vld [vmem:[#allocation4 + $0x10] sm:$0xff]  ;;  %vm479_vm13 = vweird.f32 %v1290_v60 }
  0xcc   :  { %v280_v6 = vpop.xlane.xlu0 %279  ;;  %v430_v7 = vld [vmem:[#allocation3 + $0x50] sm:$0xff]  ;;  %v475_v44 = vmul.f32 0.5, %v474_v23  ;;  %v496_v48 = vsub.f32 1.5, %v495_v26  ;;  %v1368_v5 = vmul.f32 %v804_v63, %v461_v51  ;;  %vm518_vm2 = vweird.f32 %v1279_v52  ;;  %vm1433_vm4 = vmor %vm478_vm11, %vm479_vm13 }
  0xcd   :  { %v300_v1 = vadd.f32 %v280_v6, %v236_v59  ;;  %v1298_v9 = vpop.eup %905  ;;  %318 = vst.msk [vmem:[#allocation3 + $0x68] sm:$0xff] %vm47_vm0, %v302_v3  ;;  %v1307_v14 = vmax.f32 %v430_v7, 1e-24  ;;  %v429_v16 = vld [vmem:[#allocation3 + $0x48] sm:$0xff]  ;;  %v486_v56 = vsub.f32 1.5, %v485_v40  ;;  %v240_v59 = vld [vmem:[#allocation3 + $0x78] sm:$0xff]  ;;  %vm508_vm5 = vweird.f32 %v1294_v2 }
  0xce   :  { %v1304_v11 = vpop.eup %907  ;;  %317 = vst.msk [vmem:[#allocation3 + $0x60] sm:$0xff] %vm47_vm0, %v301_v8  ;;  %v428_v18 = vld [vmem:[#allocation3 + $0x40] sm:$0xff]  ;;  %v523_v21 = vmul.f32 %v1298_v9, %v1275_v49  ;;  %v1320_v27 = vmax.f32 %v429_v16, 1e-24  ;;  %v476_v0 = vsub.f32 1.5, %v475_v44  ;;  %v1371_v6 = vmul.f32 %v1282_v53, %v496_v48  ;;  %v327_v51 = vld [vmem:[#allocation4 + $0x30] sm:$0xff] }
  0xcf   :  { %316 = vst.msk [vmem:[#allocation3 + $0x58] sm:$0xff] %vm47_vm0, %v300_v1  ;;  %v513_v24 = vmul.f32 %v1304_v11, %v1279_v52  ;;  %911 = vrsqrt.f32 %v1307_v14  ;;  %v1322_v28 = vmax.f32 %v428_v18, 1e-24  ;;  %v1324_v31 = vpop.eup %909  ;;  %v487_v23 = vmul.f32 %v1288_v57, %v486_v56 }
  0xd0   :  { %v524_v41 = vmul.f32 %v1298_v9, %v523_v21  ;;  %v503_v42 = vmul.f32 %v1324_v31, %v1294_v2  ;;  %913 = vrsqrt.f32 %v1320_v27  ;;  %vm529_vm1 = vweird.f32 %v1298_v9 }
  0xd1   :  { %v514_v45 = vmul.f32 %v1304_v11, %v513_v24  ;;  %915 = vrsqrt.f32 %v1322_v28  ;;  %v491_v34 = vsel %vm1411_vm15, %v1288_v57, %v487_v23  ;;  %vm519_vm3 = vweird.f32 %v1304_v11  ;;  %vm1453_vm6 = vmor %vm528_vm12, %vm529_vm1 }
  0xd2   :  { %v354_v29 = vpop.xlane.xlu2 %353  ;;  %v288_v38 = vpop.xlane.xlu1 %287  ;;  %v504_v33 = vmul.f32 %v1324_v31, %v503_v42  ;;  %v525_v58 = vmul.f32 0.5, %v524_v41  ;;  %vm509_vm7 = vweird.f32 %v1324_v31  ;;  %vm1469_vm8 = vmor %vm518_vm2, %vm519_vm3  ;;  %vm548_vm10 = vweird.f32 %v1320_v27 }
  0xd3   :  { %v385_v37 = vadd.f32 %v354_v29, %v321_v22  ;;  %v515_v3 = vmul.f32 0.5, %v514_v45  ;;  %v304_v13 = vadd.f32 %v288_v38, %v240_v59  ;;  %v477_v29 = vmul.f32 %v1290_v60, %v476_v0  ;;  %v807_v59 = vld [vmem:[#allocation2 + $0x18] sm:$0xff]  ;;  %vm1486_vm9 = vmor %vm508_vm5, %vm509_vm7 }
  0xd4   :  { %v286_v39 = vpop.xlane.xlu0 %285  ;;  %v505_v10 = vmul.f32 0.5, %v504_v33  ;;  %v433_v12 = vld [vmem:[#allocation3 + $0x68] sm:$0xff]  ;;  %v526_v24 = vsub.f32 1.5, %v525_v58  ;;  %vm538_vm11 = vweird.f32 %v1322_v28  ;;  %vm558_vm15 = vweird.f32 %v1307_v14 }
  0xd5   :  { %v432_v17 = vld [vmem:[#allocation3 + $0x60] sm:$0xff]  ;;  %401 = vst.msk [vmem:[#allocation4] sm:$0xff] %vm47_vm0, %v385_v37  ;;  %v1353_v19 = vpop.eup %911  ;;  %v303_v15 = vadd.f32 %v286_v39, %v239_v61  ;;  %v516_v32 = vsub.f32 1.5, %v515_v3  ;;  %v1400_v40 = vmax.f32 %v433_v12, 1e-24  ;;  %v481_v36 = vsel %vm1433_vm4, %v1290_v60, %v477_v29  ;;  %v326_v3 = vld [vmem:[#allocation4 + $0x28] sm:$0xff] }
  0xd6   :  { %v1360_v54 = vmax.f32 %v432_v17, 1e-24  ;;  %v431_v55 = vld [vmem:[#allocation3 + $0x58] sm:$0xff]  ;;  %v553_v4 = vmul.f32 %v1353_v19, %v1307_v14  ;;  %v1378_v1 = vpop.eup %913  ;;  %320 = vst.msk [vmem:[#allocation3 + $0x78] sm:$0xff] %vm47_vm0, %v304_v13  ;;  %v506_v44 = vsub.f32 1.5, %v505_v10  ;;  %v501_v17 = vsel %vm1395_vm14, %v1282_v53, %v1371_v6  ;;  %v806_v13 = vld [vmem:[#allocation2 + $0x10] sm:$0xff] }
  0xd7   :  { %v1376_v7 = vmax.f32 %v431_v55, 1e-24  ;;  %v1380_v22 = vpop.eup %915  ;;  %v543_v25 = vmul.f32 %v1378_v1, %v1320_v27  ;;  %319 = vst.msk [vmem:[#allocation3 + $0x70] sm:$0xff] %vm47_vm0, %v303_v15  ;;  %v527_v46 = vmul.f32 %v1298_v9, %v526_v24  ;;  %v517_v53 = vmul.f32 %v1304_v11, %v516_v32  ;;  %v808_v55 = vld [vmem:[#allocation2 + $0x20] sm:$0xff] }
  0xd8   :  { %917 = vrsqrt.f32 %v1360_v54  ;;  %v533_v37 = vmul.f32 %v1380_v22, %v1322_v28  ;;  %v554_v39 = vmul.f32 %v1353_v19, %v553_v4  ;;  %v1461_v4 = vmul.f32 %v808_v55, %v501_v17 }
  0xd9   :  { %919 = vrsqrt.f32 %v1376_v7  ;;  %v544_v45 = vmul.f32 %v1378_v1, %v543_v25  ;;  %v531_v15 = vsel %vm1453_vm6, %v1298_v9, %v527_v46  ;;  %v1480_v23 = vmul.f32 %v806_v13, %v481_v36  ;;  %v811_v25 = vld [vmem:[#allocation2 + $0x38] sm:$0xff]  ;;  %v330_v46 = vld [vmem:[#allocation4 + $0x48] sm:$0xff] }
  0xda   :  { %v360_v8 = vpop.xlane.xlu2 %359  ;;  %v358_v18 = vpop.xlane.xlu1 %357  ;;  %v534_v48 = vmul.f32 %v1380_v22, %v533_v37  ;;  %v555_v56 = vmul.f32 0.5, %v554_v39  ;;  %v809_v37 = vld [vmem:[#allocation2 + $0x28] sm:$0xff]  ;;  %v1502_v38 = vmul.f32 %v811_v25, %v531_v15  ;;  %vm559_vm12 = vweird.f32 %v1353_v19 }
  0xdb   :  { %v388_v16 = vadd.f32 %v360_v8, %v324_v62  ;;  %v387_v42 = vadd.f32 %v358_v18, %v323_v20  ;;  %v507_v62 = vmul.f32 %v1324_v31, %v506_v44  ;;  %v545_v60 = vmul.f32 0.5, %v544_v45 }
  0xdc   :  { %v356_v21 = vpop.xlane.xlu0 %355  ;;  %v612_v26 = vld [vmem:[#allocation4] sm:$0xff]  ;;  %v1463_v8 = vmul.f32 %v807_v59, %v491_v34  ;;  %v535_v18 = vmul.f32 0.5, %v534_v48  ;;  %vm549_vm13 = vweird.f32 %v1378_v1  ;;  %vm539_vm14 = vweird.f32 %v1380_v22 }
  0xdd   :  { %v1402_v41 = vmax.f32 %v612_v26, 1e-24  ;;  %404 = vst.msk [vmem:[#allocation4 + $0x18] sm:$0xff] %vm47_vm0, %v388_v16  ;;  %v386_v10 = vadd.f32 %v356_v21, %v322_v50  ;;  %v521_v16 = vsel %vm1469_vm8, %v1304_v11, %v517_v53  ;;  %v556_v21 = vsub.f32 1.5, %v555_v56  ;;  %v810_v26 = vld [vmem:[#allocation2 + $0x30] sm:$0xff]  ;;  %v325_v34 = vld [vmem:[#allocation4 + $0x20] sm:$0xff]  ;;  %vm1541_vm4 = vmor %vm548_vm10, %vm549_vm13 }
  0xde   :  { %v1405_v43 = vpop.eup %917  ;;  %403 = vst.msk [vmem:[#allocation4 + $0x10] sm:$0xff] %vm47_vm0, %v387_v42  ;;  %v511_v29 = vsel %vm1486_vm9, %v1324_v31, %v507_v62  ;;  %v546_v32 = vsub.f32 1.5, %v545_v60  ;;  %v1504_v39 = vmul.f32 %v810_v26, %v521_v16  ;;  %v435_v31 = vld [vmem:[#allocation3 + $0x78] sm:$0xff]  ;;  %v536_v44 = vsub.f32 1.5, %v535_v18  ;;  %v434_v18 = vld [vmem:[#allocation3 + $0x70] sm:$0xff]  ;;  %vm1555_vm5 = vmor %vm538_vm11, %vm539_vm14 }
  0xdf   :  { %v573_v57 = vmul.f32 %v1405_v43, %v1360_v54  ;;  %921 = vrsqrt.f32 %v1402_v41  ;;  %v1442_v33 = vpop.eup %919  ;;  %402 = vst.msk [vmem:[#allocation4 + $0x8] sm:$0xff] %vm47_vm0, %v386_v10  ;;  %v1512_v47 = vmul.f32 %v809_v37, %v511_v29  ;;  %v1515_v53 = vmul.f32 %v1353_v19, %v556_v21  ;;  %vm1590_vm9 = vmor %vm558_vm15, %vm559_vm12 }
  0xe0   :  { %923 = vrsqrt.f32 %v1400_v40  ;;  %v563_v63 = vmul.f32 %v1442_v33, %v1376_v7  ;;  %v1520_v55 = vmul.f32 %v1378_v1, %v546_v32  ;;  %v1524_v56 = vmax.f32 %v435_v31, 1e-24 }
  0xe1   :  { %v574_v20 = vmul.f32 %v1405_v43, %v573_v57  ;;  %vm578_vm1 = vweird.f32 %v1360_v54  ;;  %v537_v49 = vmul.f32 %v1380_v22, %v536_v44  ;;  %vm568_vm2 = vweird.f32 %v1376_v7 }
  0xe2   :  { %v366_v58 = vpop.xlane.xlu2 %365  ;;  %v364_v0 = vpop.xlane.xlu1 %363  ;;  %v564_v9 = vmul.f32 %v1442_v33, %v563_v63  ;;  %vm650_vm6 = vweird.f32 %v1402_v41  ;;  %v551_v32 = vsel %vm1541_vm4, %v1378_v1, %v1520_v55  ;;  %vm579_vm7 = vweird.f32 %v1405_v43  ;;  %v331_v55 = vld [vmem:[#allocation4 + $0x50] sm:$0xff] }
  0xe3   :  { %v391_v12 = vadd.f32 %v366_v58, %v327_v51  ;;  %v390_v24 = vadd.f32 %v364_v0, %v326_v3  ;;  %v575_v45 = vmul.f32 0.5, %v574_v20  ;;  %v329_v51 = vld [vmem:[#allocation4 + $0x40] sm:$0xff]  ;;  %v328_v3 = vld [vmem:[#allocation4 + $0x38] sm:$0xff]  ;;  %v1572_v28 = vmax.f32 %v434_v18, 1e-24  ;;  %vm1620_vm11 = vmor %vm578_vm1, %vm579_vm7 }
  0xe4   :  { %v362_v6 = vpop.xlane.xlu0 %361  ;;  %v615_v30 = vld [vmem:[#allocation4 + $0x18] sm:$0xff]  ;;  %v565_v48 = vmul.f32 0.5, %v564_v9  ;;  %v541_v37 = vsel %vm1555_vm5, %v1380_v22, %v537_v49  ;;  %vm569_vm10 = vweird.f32 %v1442_v33  ;;  %v561_v14 = vsel %vm1590_vm9, %v1353_v19, %v1515_v53 }
  0xe5   :  { %v1492_v11 = vpop.eup %921  ;;  %407 = vst.msk [vmem:[#allocation4 + $0x30] sm:$0xff] %vm47_vm0, %v391_v12  ;;  %v614_v17 = vld [vmem:[#allocation4 + $0x10] sm:$0xff]  ;;  %v1526_v58 = vmax.f32 %v615_v30, 1e-24  ;;  %v389_v63 = vadd.f32 %v362_v6, %v325_v34  ;;  %v576_v10 = vsub.f32 1.5, %v575_v45  ;;  %vm1634_vm12 = vmor %vm568_vm2, %vm569_vm10 }
  0xe6   :  { %v1500_v2 = vpop.eup %923  ;;  %v645_v42 = vmul.f32 %v1492_v11, %v1402_v41  ;;  %406 = vst.msk [vmem:[#allocation4 + $0x28] sm:$0xff] %vm47_vm0, %v390_v24  ;;  %v1529_v60 = vmax.f32 %v614_v17, 1e-24  ;;  %v613_v12 = vld [vmem:[#allocation4 + $0x8] sm:$0xff]  ;;  %v566_v15 = vsub.f32 1.5, %v565_v48  ;;  %vm651_vm3 = vweird.f32 %v1492_v11  ;;  %v333_v41 = vld [vmem:[#allocation4 + $0x60] sm:$0xff] }
  0xe7   :  { %v583_v36 = vmul.f32 %v1500_v2, %v1400_v40  ;;  %925 = vrsqrt.f32 %v1526_v58  ;;  %405 = vst.msk [vmem:[#allocation4 + $0x20] sm:$0xff] %vm47_vm0, %v389_v63  ;;  %v1546_v52 = vmax.f32 %v613_v12, 1e-24  ;;  %vm652_vm8 = vmor %vm650_vm6, %vm651_vm3  ;;  %v332_v17 = vld [vmem:[#allocation4 + $0x58] sm:$0xff]  ;;  %v813_v48 = vld [vmem:[#allocation2 + $0x48] sm:$0xff]  ;;  %vm680_vm13 = vweird.f32 %v1526_v58 }
  0xe8   :  { %v646_v57 = vmul.f32 %v1492_v11, %v645_v42  ;;  %927 = vrsqrt.f32 %v1529_v60  ;;  %v1580_v42 = vmul.f32 %v1405_v43, %v576_v10  ;;  %v1595_v22 = vmul.f32 %v1442_v33, %v566_v15 }
  0xe9   :  { %929 = vrsqrt.f32 %v1524_v56  ;;  %v584_v25 = vmul.f32 %v1500_v2, %v583_v36  ;;  %vm670_vm14 = vweird.f32 %v1529_v60  ;;  %vm660_vm15 = vweird.f32 %v1546_v52 }
  0xea   :  { %v372_v50 = vpop.xlane.xlu2 %371  ;;  %v370_v59 = vpop.xlane.xlu1 %369  ;;  %v647_v62 = vmul.f32 0.5, %v646_v57  ;;  %931 = vrsqrt.f32 %v1546_v52  ;;  %v571_v15 = vsel %vm1634_vm12, %v1442_v33, %v1595_v22 }
  0xeb   :  { %v394_v0 = vadd.f32 %v372_v50, %v330_v46  ;;  %v393_v13 = vadd.f32 %v370_v59, %v329_v51  ;;  %v812_v46 = vld [vmem:[#allocation2 + $0x40] sm:$0xff]  ;;  %v1606_v57 = vmul.f32 0.5, %v584_v25  ;;  %v1612_v59 = vmul.f32 %v813_v48, %v551_v32 }
  0xec   :  { %v368_v61 = vpop.xlane.xlu0 %367  ;;  %v648_v16 = vsub.f32 1.5, %v647_v62  ;;  %v618_v20 = vld [vmem:[#allocation4 + $0x30] sm:$0xff]  ;;  %v815_v62 = vld [vmem:[#allocation2 + $0x58] sm:$0xff] }
  0xed   :  { %v1548_v21 = vmax.f32 %v618_v20, 1e-24  ;;  %v617_v9 = vld [vmem:[#allocation4 + $0x28] sm:$0xff]  ;;  %410 = vst.msk [vmem:[#allocation4 + $0x48] sm:$0xff] %vm47_vm0, %v394_v0  ;;  %v392_v24 = vadd.f32 %v368_v61, %v328_v3  ;;  %v1584_v30 = vpop.eup %925  ;;  %v1614_v61 = vmul.f32 %v812_v46, %v541_v37  ;;  %v581_v3 = vsel %vm1620_vm11, %v1405_v43, %v1580_v42 }
  0xee   :  { %v649_v26 = vmul.f32 %v1492_v11, %v648_v16  ;;  %v1562_v29 = vmax.f32 %v617_v9, 1e-24  ;;  %409 = vst.msk [vmem:[#allocation4 + $0x40] sm:$0xff] %vm47_vm0, %v393_v13  ;;  %v1600_v34 = vpop.eup %927  ;;  %v675_v50 = vmul.f32 %v1584_v30, %v1526_v58  ;;  %v616_v10 = vld [vmem:[#allocation4 + $0x20] sm:$0xff]  ;;  %vm681_vm1 = vweird.f32 %v1584_v30 }
  0xef   :  { %408 = vst.msk [vmem:[#allocation4 + $0x38] sm:$0xff] %vm47_vm0, %v392_v24  ;;  %933 = vrsqrt.f32 %v1548_v21  ;;  %v1610_v36 = vpop.eup %929  ;;  %v665_v0 = vmul.f32 %v1600_v34, %v1529_v60  ;;  %v1668_v32 = vmax.f32 %v616_v10, 1e-24  ;;  %vm671_vm2 = vweird.f32 %v1600_v34  ;;  %vm682_vm4 = vmor %vm680_vm13, %vm681_vm1 }
  0xf0   :  { %v653_v1 = vsel %vm652_vm8, %v1492_v11, %v649_v26  ;;  %935 = vrsqrt.f32 %v1562_v29  ;;  %v676_v54 = vmul.f32 %v1584_v30, %v675_v50  ;;  %v1641_v13 = vpop.eup %931  ;;  %v1657_v20 = vmul.f32 %v1610_v36, %v1524_v56  ;;  %vm672_vm6 = vmor %vm670_vm14, %vm671_vm2 }
  0xf1   :  { %v836_v11 = vmul.f32 %v1368_v5, %v653_v1  ;;  %937 = vrsqrt.f32 %v1572_v28  ;;  %v666_v7 = vmul.f32 %v1600_v34, %v665_v0  ;;  %v655_v9 = vmul.f32 %v1641_v13, %v1546_v52 }
  0xf2   :  { %v378_v31 = vpop.xlane.xlu2 %377  ;;  %v376_v45 = vpop.xlane.xlu1 %375  ;;  %v677_v6 = vmul.f32 0.5, %v676_v54  ;;  %vm710_vm3 = vweird.f32 %v1548_v21  ;;  %vm661_vm5 = vweird.f32 %v1641_v13  ;;  %939 = vrsqrt.f32 %v1668_v32 }
  0xf3   :  { %v397_v51 = vadd.f32 %v378_v31, %v333_v41  ;;  %v852_v63 = vmul.f32 20.0, %v836_v11  ;;  %v396_v12 = vadd.f32 %v376_v45, %v332_v17  ;;  %v667_v25 = vmul.f32 0.5, %v666_v7  ;;  %vm662_vm10 = vmor %vm660_vm15, %vm661_vm5 }
  0xf4   :  { %v374_v5 = vpop.xlane.xlu0 %373  ;;  %v621_v24 = vld [vmem:[#allocation4 + $0x48] sm:$0xff]  ;;  %v678_v41 = vsub.f32 1.5, %v677_v6  ;;  %v656_v37 = vmul.f32 %v1641_v13, %v655_v9  ;;  %vm700_vm14 = vweird.f32 %v1562_v29  ;;  %vm690_vm12 = vweird.f32 %v1668_v32 }
  0xf5   :  { %413 = vst.msk [vmem:[#allocation4 + $0x60] sm:$0xff] %vm47_vm0, %v397_v51  ;;  %v395_v16 = vadd.f32 %v374_v5, %v331_v55  ;;  %v1653_v18 = vpop.eup %933  ;;  %v668_v31 = vsub.f32 1.5, %v667_v25  ;;  %v1677_v45 = vmax.f32 %v621_v24, 1e-24  ;;  %v620_v54 = vld [vmem:[#allocation4 + $0x40] sm:$0xff]  ;;  %v586_v44 = vsub.f32 1.5, %v1606_v57 }
  0xf6   :  { %868 = vst.msk [vmem:[%s1967_s2] sm:$0xff] %vm47_vm0, %v852_v63  ;;  %v1663_v27 = vpop.eup %935  ;;  %v705_v26 = vmul.f32 %v1653_v18, %v1548_v21  ;;  %v679_v46 = vmul.f32 %v1584_v30, %v678_v41  ;;  %v657_v48 = vmul.f32 0.5, %v656_v37  ;;  %vm711_vm7 = vweird.f32 %v1653_v18  ;;  %v619_v10 = vld [vmem:[#allocation4 + $0x38] sm:$0xff]  ;;  %v816_v41 = vld [vmem:[#allocation2 + $0x60] sm:$0xff] }
  0xf7   :  { %412 = vst.msk [vmem:[#allocation4 + $0x58] sm:$0xff] %vm47_vm0, %v396_v12  ;;  %v695_v1 = vmul.f32 %v1663_v27, %v1562_v29  ;;  %v1679_v17 = vpop.eup %937  ;;  %v669_v51 = vmul.f32 %v1600_v34, %v668_v31  ;;  %941 = vrsqrt.f32 %v1677_v45  ;;  %vm701_vm8 = vweird.f32 %v1663_v27  ;;  %vm712_vm13 = vmor %vm710_vm3, %vm711_vm7 }
  0xf8   :  { %411 = vst.msk [vmem:[#allocation4 + $0x50] sm:$0xff] %vm47_vm0, %v395_v16  ;;  %v706_v11 = vmul.f32 %v1653_v18, %v705_v26  ;;  %v683_v55 = vsel %vm682_vm4, %v1584_v30, %v679_v46  ;;  %v658_v63 = vsub.f32 1.5, %v657_v48  ;;  %v1706_v24 = vmax.f32 %v619_v10, 1e-24  ;;  %v1715_v52 = vpop.eup %939  ;;  %vm702_vm15 = vmor %vm700_vm14, %vm701_vm8 }
  0xf9   :  { %v696_v50 = vmul.f32 %v1663_v27, %v695_v1  ;;  %v839_v58 = vmul.f32 %v1463_v8, %v683_v55  ;;  %v673_v12 = vsel %vm672_vm6, %v1600_v34, %v669_v51  ;;  %v1704_v34 = vmax.f32 %v620_v54, 1e-24 }
  0xfa   :  { %v707_v5 = vmul.f32 0.5, %v706_v11  ;;  %v838_v16 = vmul.f32 %v1480_v23, %v673_v12  ;;  %v659_v30 = vmul.f32 %v1641_v13, %v658_v63  ;;  %v1733_v29 = vmul.f32 %v816_v41, %v581_v3  ;;  %v384_v48 = vpop.xlane.xlu2 %383  ;;  %v382_v55 = vpop.xlane.xlu1 %381 }
  0xfb   :  { %v697_v0 = vmul.f32 0.5, %v696_v50  ;;  %v855_v9 = vmul.f32 20.0, %v839_v58  ;;  %943 = vrsqrt.f32 %v1704_v34  ;;  %v685_v1 = vmul.f32 %v1715_v52, %v1668_v32 }
  0xfc   :  { %v708_v7 = vsub.f32 1.5, %v707_v5  ;;  %v624_v60 = vld [vmem:[#allocation4 + $0x60] sm:$0xff]  ;;  %v854_v25 = vmul.f32 20.0, %v838_v16  ;;  %v663_v23 = vsel %vm662_vm10, %v1641_v13, %v659_v30  ;;  %v593_v43 = vmul.f32 %v1679_v17, %v1572_v28  ;;  %v380_v63 = vpop.xlane.xlu0 %379 }
  0xfd   :  { %v698_v6 = vsub.f32 1.5, %v697_v0  ;;  %871 = vst.msk [vmem:[%s1967_s2 + $0x18] sm:$0xff] %vm47_vm0, %v855_v9  ;;  %v837_v37 = vmul.f32 %v1365_v35, %v663_v23  ;;  %v1726_v21 = vmax.f32 %v624_v60, 1e-24  ;;  %v1743_v11 = vpop.eup %941  ;;  %945 = vrsqrt.f32 %v1706_v24  ;;  %v334_v0 = vld [vmem:[#allocation4 + $0x68] sm:$0xff] }
  0xfe   :  { %v709_v8 = vmul.f32 %v1653_v18, %v708_v7  ;;  %870 = vst.msk [vmem:[%s1967_s2 + $0x10] sm:$0xff] %vm47_vm0, %v854_v25  ;;  %v623_v31 = vld [vmem:[#allocation4 + $0x58] sm:$0xff]  ;;  %v686_v51 = vmul.f32 %v1715_v52, %v685_v1  ;;  %v735_v5 = vmul.f32 %v1743_v11, %v1677_v45  ;;  %v604_v54 = vmul.f32 %v1610_v36, %v1657_v20 }
  0xff   :  { %v699_v26 = vmul.f32 %v1663_v27, %v698_v6  ;;  %v853_v42 = vmul.f32 20.0, %v837_v37  ;;  %v622_v46 = vld [vmem:[#allocation4 + $0x50] sm:$0xff]  ;;  %947 = vrsqrt.f32 %v1726_v21  ;;  %v1766_v22 = vmax.f32 %v623_v31, 1e-24 }
 0x100   :  { %v713_v13 = vsel %vm712_vm13, %v1653_v18, %v709_v8  ;;  %v687_v49 = vmul.f32 0.5, %v686_v51  ;;  %v1773_v10 = vmax.f32 %v622_v46, 1e-24  ;;  %v594_v12 = vmul.f32 %v1679_v17, %v593_v43 }
 0x101   :  { %v842_v35 = vmul.f32 %v1504_v39, %v713_v13  ;;  %v703_v18 = vsel %vm702_vm15, %v1663_v27, %v699_v26  ;;  %v336_v39 = vld [vmem:[#allocation4 + $0x78] sm:$0xff]  ;;  %v1754_v27 = vmul.f32 %v815_v62, %v571_v15  ;;  %869 = vst.msk [vmem:[%s1967_s2 + $0x8] sm:$0xff] %vm47_vm0, %v853_v42  ;;  %v736_v15 = vmul.f32 %v1743_v11, %v735_v5  ;;  %v1775_v58 = vpop.eup %943 }
 0x102   :  { %v841_v3 = vmul.f32 %v1512_v47, %v703_v18  ;;  %v335_v47 = vld [vmem:[#allocation4 + $0x70] sm:$0xff]  ;;  %v400_v20 = vadd.f32 %v384_v48, %v336_v39  ;;  %949 = vrsqrt.f32 %v1766_v22  ;;  %v398_v16 = vadd.f32 %v380_v63, %v334_v0 }
 0x103   :  { %v858_v50 = vmul.f32 20.0, %v842_v35  ;;  %v399_v7 = vadd.f32 %v382_v55, %v335_v47  ;;  %v688_v30 = vsub.f32 1.5, %v687_v49  ;;  %vm691_vm11 = vweird.f32 %v1715_v52  ;;  %v1787_v9 = vpop.eup %945 }
 0x104   :  { %v857_v33 = vmul.f32 20.0, %v841_v3  ;;  %v737_v6 = vmul.f32 0.5, %v736_v15  ;;  %v725_v60 = vmul.f32 %v1775_v58, %v1704_v34  ;;  %416 = vst.msk [vmem:[#allocation4 + $0x78] sm:$0xff] %vm47_vm0, %v400_v20  ;;  %v1789_v8 = vmul.f32 0.5, %v604_v54  ;;  %vm692_vm2 = vmor %vm690_vm12, %vm691_vm11 }
 0x105   :  { %874 = vst.msk [vmem:[%s1967_s2 + $0x30] sm:$0xff] %vm47_vm0, %v858_v50  ;;  %vm741_vm1 = vweird.f32 %v1743_v11  ;;  %951 = vrsqrt.f32 %v1773_v10  ;;  %v689_v25 = vmul.f32 %v1715_v52, %v688_v30  ;;  %v715_v41 = vmul.f32 %v1787_v9, %v1706_v24  ;;  %v1800_v37 = vpop.eup %947 }
 0x106   :  { %873 = vst.msk [vmem:[%s1967_s2 + $0x28] sm:$0xff] %vm47_vm0, %v857_v33  ;;  %v738_v23 = vsub.f32 1.5, %v737_v6  ;;  %v726_v26 = vmul.f32 %v1775_v58, %v725_v60  ;;  %v1802_v13 = vmul.f32 0.5, %v594_v12  ;;  %vm740_vm3 = vweird.f32 %v1677_v45 }
 0x107   :  { %415 = vst.msk [vmem:[#allocation4 + $0x70] sm:$0xff] %vm47_vm0, %v399_v7  ;;  %vm730_vm4 = vweird.f32 %v1704_v34  ;;  %vm720_vm5 = vweird.f32 %v1706_v24  ;;  %v693_v32 = vsel %vm692_vm2, %v1715_v52, %v689_v25  ;;  %v716_v1 = vmul.f32 %v1787_v9, %v715_v41  ;;  %vm742_vm6 = vmor %vm740_vm3, %vm741_vm1 }
 0x108   :  { %414 = vst.msk [vmem:[#allocation4 + $0x68] sm:$0xff] %vm47_vm0, %v398_v16  ;;  %v739_v35 = vmul.f32 %v1743_v11, %v738_v23  ;;  %v727_v18 = vmul.f32 0.5, %v726_v26  ;;  %v1812_v31 = vpop.eup %949  ;;  %v840_v62 = vmul.f32 %v1461_v4, %v693_v32  ;;  %vm731_vm7 = vweird.f32 %v1775_v58 }
 0x109   :  { %v765_v45 = vmul.f32 %v1800_v37, %v1726_v21  ;;  %vm770_vm8 = vweird.f32 %v1726_v21  ;;  %v717_v42 = vmul.f32 0.5, %v716_v1  ;;  %v755_v3 = vmul.f32 %v1812_v31, %v1766_v22  ;;  %vm732_vm14 = vmor %vm730_vm4, %vm731_vm7  ;;  %v814_v21 = vld [vmem:[#allocation2 + $0x50] sm:$0xff] }
 0x10a   :  { %v743_v52 = vsel %vm742_vm6, %v1743_v11, %v739_v35  ;;  %v728_v43 = vsub.f32 1.5, %v727_v18  ;;  %vm760_vm10 = vweird.f32 %v1766_v22  ;;  %v856_v46 = vmul.f32 20.0, %v840_v62 }
 0x10b   :  { %v1825_v4 = vpop.eup %951  ;;  %v845_v48 = vmul.f32 %v1612_v59, %v743_v52  ;;  %vm721_vm13 = vweird.f32 %v1787_v9  ;;  %v766_v39 = vmul.f32 %v1800_v37, %v765_v45  ;;  %v627_v50 = vld [vmem:[#allocation4 + $0x78] sm:$0xff]  ;;  %v718_v11 = vsub.f32 1.5, %v717_v42 }
 0x10c   :  { %v729_v51 = vmul.f32 %v1775_v58, %v728_v43  ;;  %v756_v5 = vmul.f32 %v1812_v31, %v755_v3  ;;  %v745_v55 = vmul.f32 %v1825_v4, %v1773_v10  ;;  %872 = vst.msk [vmem:[%s1967_s2 + $0x20] sm:$0xff] %vm47_vm0, %v856_v46  ;;  %vm771_vm15 = vweird.f32 %v1800_v37  ;;  %vm722_vm11 = vmor %vm720_vm5, %vm721_vm13 }
 0x10d   :  { %v861_v47 = vmul.f32 20.0, %v845_v48  ;;  %v767_v59 = vmul.f32 0.5, %v766_v39  ;;  %v1843_v63 = vmax.f32 %v627_v50, 1e-24  ;;  %v719_v33 = vmul.f32 %v1787_v9, %v718_v11  ;;  %vm772_vm1 = vmor %vm770_vm8, %vm771_vm15 }
 0x10e   :  { %v626_v0 = vld [vmem:[#allocation4 + $0x70] sm:$0xff]  ;;  %v733_v54 = vsel %vm732_vm14, %v1775_v58, %v729_v51  ;;  %v757_v49 = vmul.f32 0.5, %v756_v5  ;;  %v746_v15 = vmul.f32 %v1825_v4, %v745_v55  ;;  %vm761_vm12 = vweird.f32 %v1812_v31  ;;  %v819_v51 = vld [vmem:[#allocation2 + $0x78] sm:$0xff] }
 0x10f   :  { %v625_v20 = vld [vmem:[#allocation4 + $0x68] sm:$0xff]  ;;  %877 = vst.msk [vmem:[%s1967_s2 + $0x48] sm:$0xff] %vm47_vm0, %v861_v47  ;;  %v844_v34 = vmul.f32 %v1614_v61, %v733_v54  ;;  %v768_v12 = vsub.f32 1.5, %v767_v59  ;;  %953 = vrsqrt.f32 %v1843_v63  ;;  %v723_v58 = vsel %vm722_vm11, %v1787_v9, %v719_v33  ;;  %vm762_vm3 = vmor %vm760_vm10, %vm761_vm12  ;;  %v818_v54 = vld [vmem:[#allocation2 + $0x70] sm:$0xff] }
 0x110   :  { %v758_v7 = vsub.f32 1.5, %v757_v49  ;;  %v747_v16 = vmul.f32 0.5, %v746_v15  ;;  %v1860_v30 = vmax.f32 %v626_v0, 1e-24  ;;  %v843_v60 = vmul.f32 %v1502_v38, %v723_v58 }
 0x111   :  { %v860_v6 = vmul.f32 20.0, %v844_v34  ;;  %v769_v61 = vmul.f32 %v1800_v37, %v768_v12  ;;  %v1864_v25 = vmax.f32 %v625_v20, 1e-24  ;;  %vm751_vm2 = vweird.f32 %v1825_v4 }
 0x112   :  { %v759_v24 = vmul.f32 %v1812_v31, %v758_v7  ;;  %v748_v23 = vsub.f32 1.5, %v747_v16  ;;  %955 = vrsqrt.f32 %v1860_v30  ;;  %v606_v9 = vsub.f32 1.5, %v1789_v8 }
 0x113   :  { %876 = vst.msk [vmem:[%s1967_s2 + $0x40] sm:$0xff] %vm47_vm0, %v860_v6  ;;  %v859_v38 = vmul.f32 20.0, %v843_v60  ;;  %v773_v26 = vsel %vm772_vm1, %v1800_v37, %v769_v61  ;;  %957 = vrsqrt.f32 %v1864_v25  ;;  %vm750_vm4 = vweird.f32 %v1773_v10 }
 0x114   :  { %v848_v41 = vmul.f32 %v1733_v29, %v773_v26  ;;  %v763_v8 = vsel %vm762_vm3, %v1812_v31, %v759_v24  ;;  %v749_v32 = vmul.f32 %v1825_v4, %v748_v23  ;;  %v830_v37 = vmul.f32 %v814_v21, %v561_v14  ;;  %vm752_vm5 = vmor %vm750_vm4, %vm751_vm2 }
 0x115   :  { %v954_v35 = vpop.eup %953  ;;  %875 = vst.msk [vmem:[%s1967_s2 + $0x38] sm:$0xff] %vm47_vm0, %v859_v38  ;;  %v847_v29 = vmul.f32 %v1754_v27, %v763_v8  ;;  %v596_v19 = vsub.f32 1.5, %v1802_v13  ;;  %v607_v31 = vmul.f32 %v1610_v36, %v606_v9  ;;  %vm609_vm9 = vweird.f32 %v1610_v36 }
 0x116   :  { %v864_v22 = vmul.f32 20.0, %v848_v41  ;;  %v753_v10 = vsel %vm752_vm5, %v1825_v4, %v749_v32  ;;  %v795_v18 = vmul.f32 %v954_v35, %v1843_v63  ;;  %vm588_vm6 = vweird.f32 %v1400_v40 }
 0x117   :  { %v863_v53 = vmul.f32 20.0, %v847_v29  ;;  %v846_v14 = vmul.f32 %v830_v37, %v753_v10  ;;  %vm589_vm7 = vweird.f32 %v1500_v2  ;;  %vm608_vm8 = vweird.f32 %v1524_v56 }
 0x118   :  { %v956_v1 = vpop.eup %955  ;;  %880 = vst.msk [vmem:[%s1967_s2 + $0x60] sm:$0xff] %vm47_vm0, %v864_v22  ;;  %v796_v27 = vmul.f32 %v954_v35, %v795_v18  ;;  %v587_v43 = vmul.f32 %v1500_v2, %v586_v44  ;;  %vm1920_vm10 = vmor %vm608_vm8, %vm609_vm9  ;;  %v597_v3 = vmul.f32 %v1679_v17, %v596_v19  ;;  %vm599_vm13 = vweird.f32 %v1679_v17 }
 0x119   :  { %v958_v62 = vpop.eup %957  ;;  %879 = vst.msk [vmem:[%s1967_s2 + $0x58] sm:$0xff] %vm47_vm0, %v863_v53  ;;  %v862_v57 = vmul.f32 20.0, %v846_v14  ;;  %v785_v13 = vmul.f32 %v956_v1, %v1860_v30  ;;  %v611_v56 = vsel %vm1920_vm10, %v1610_v36, %v607_v31  ;;  %vm801_vm14 = vweird.f32 %v954_v35  ;;  %vm1935_vm15 = vmor %vm588_vm6, %vm589_vm7 }
 0x11a   :  { %v797_v45 = vmul.f32 0.5, %v796_v27  ;;  %v775_v52 = vmul.f32 %v958_v62, %v1864_v25  ;;  %vm598_vm11 = vweird.f32 %v1572_v28  ;;  %vm800_vm1 = vweird.f32 %v1843_v63  ;;  %v817_v63 = vld [vmem:[#allocation2 + $0x68] sm:$0xff] }
 0x11b   :  { %878 = vst.msk [vmem:[%s1967_s2 + $0x50] sm:$0xff] %vm47_vm0, %v862_v57  ;;  %v786_v4 = vmul.f32 %v956_v1, %v785_v13  ;;  %vm1940_vm12 = vmor %vm598_vm11, %vm599_vm13  ;;  %v835_v55 = vmul.f32 %v819_v51, %v611_v56  ;;  %vm791_vm3 = vweird.f32 %v956_v1  ;;  %v591_v28 = vsel %vm1935_vm15, %v1500_v2, %v587_v43 }
 0x11c   :  { %v798_v46 = vsub.f32 1.5, %v797_v45  ;;  %v776_v48 = vmul.f32 %v958_v62, %v775_v52  ;;  %v601_v40 = vsel %vm1940_vm12, %v1679_v17, %v597_v3  ;;  %vm802_vm2 = vmor %vm800_vm1, %vm801_vm14  ;;  %vm781_vm4 = vweird.f32 %v958_v62 }
 0x11d   :  { %v787_v50 = vmul.f32 0.5, %v786_v4  ;;  %vm790_vm5 = vweird.f32 %v1860_v30  ;;  %v834_v15 = vmul.f32 %v818_v54, %v601_v40  ;;  %vm780_vm6 = vweird.f32 %v1864_v25 }
 0x11e   :  { %v799_v5 = vmul.f32 %v954_v35, %v798_v46  ;;  %v777_v36 = vmul.f32 0.5, %v776_v48  ;;  %vm792_vm9 = vmor %vm790_vm5, %vm791_vm3  ;;  %v833_v17 = vmul.f32 %v817_v63, %v591_v28 }
 0x11f   :  { %v788_v47 = vsub.f32 1.5, %v787_v50  ;;  %vm782_vm7 = vmor %vm780_vm6, %vm781_vm4 }
 0x120   :  { %v803_v59 = vsel %vm802_vm2, %v954_v35, %v799_v5  ;;  %v778_v0 = vsub.f32 1.5, %v777_v36 }
 0x121   :  { %v851_v33 = vmul.f32 %v835_v55, %v803_v59  ;;  %v789_v49 = vmul.f32 %v956_v1, %v788_v47 }
 0x122   :  { %v779_v20 = vmul.f32 %v958_v62, %v778_v0 }
 0x123   :  { %v867_v34 = vmul.f32 20.0, %v851_v33  ;;  %v793_v12 = vsel %vm792_vm9, %v956_v1, %v789_v49 }
 0x124   :  { %v850_v58 = vmul.f32 %v834_v15, %v793_v12  ;;  %v783_v2 = vsel %vm782_vm7, %v958_v62, %v779_v20 }
 0x125   :  { %883 = vst.msk [vmem:[%s1967_s2 + $0x78] sm:$0xff] %vm47_vm0, %v867_v34  ;;  %v849_v7 = vmul.f32 %v833_v17, %v783_v2 }
 0x126   :  { %v866_v16 = vmul.f32 20.0, %v850_v58 }
 0x127   :  { %v865_v30 = vmul.f32 20.0, %v849_v7 }
 0x128   :  { %882 = vst.msk [vmem:[%s1967_s2 + $0x70] sm:$0xff] %vm47_vm0, %v866_v16 }
 0x129   :  { %881 = vst.msk [vmem:[%s1967_s2 + $0x68] sm:$0xff] %vm47_vm0, %v865_v30 }
 0x12a   :  { %888 = vsyncpa [#allocation6], 1 }
 0x12b   :  { %889 = vsyncpa [#allocation8], 1 }

</bundles_post_ra>
